<compile_context>
chip_gen: v7x
topology: tpu7x:2x2x1
jax: 0.10.0
libtpu: 0.0.40
codegen_flags: <defaults>
</compile_context>

<pallas_src>
import functools

import jax
import jax.numpy as jnp
from jax.experimental import pallas as pl
from jax.experimental.pallas import tpu as pltpu

# ------------------------- model hyper-parameters ---------------------------
B, C, H, W = 2, 4, 16, 16          # NCHW input
D_IN = C * H * W                   # 1024
HIDDEN = 128                       # featurizer output dim
NUM_CLASSES = 8                    # classifier output dim
DROPOUT_RATE = 0.5
MAX_TILE_B = 256                   # batch rows per grid step at large batch


# ------------------------------- kernel -------------------------------------
def _dropout_model_kernel(seed_ref, x_ref, wf_ref, bf_ref, wc_ref, bc_ref,
                          out_ref, *, dropout_rate, tile_b, hidden):
    # featurizer: Linear(D_in -> HIDDEN); bf16 MXU inputs, f32 accumulation
    feats = jnp.dot(x_ref[...], wf_ref[...],
                    preferred_element_type=jnp.float32) + bf_ref[...]

    # dropout (training mode).  The 1/(1-p) scale is already folded into wc,
    # so here we only zero out dropped elements.
    if dropout_rate > 0.0:
        pid = pl.program_id(0)
        row = jax.lax.broadcasted_iota(jnp.int32, (tile_b, hidden), 0) + pid * tile_b
        col = jax.lax.broadcasted_iota(jnp.int32, (tile_b, hidden), 1)
        ctr = (row * hidden + col).astype(jnp.uint32)        # global element id
        seed_u = seed_ref[0].astype(jnp.uint32)

        # splitmix32-style mixer (pure uint32 VPU ops: mul/xor/shift)
        h = ctr * jnp.asarray(0x9E3779B9, jnp.uint32) + seed_u
        h = (h ^ (h >> 16)) * jnp.asarray(0x7FEB352D, jnp.uint32)
        h = (h ^ (h >> 15)) * jnp.asarray(0x846CA68B, jnp.uint32)
        bits = h ^ (h >> 16)

        # integer threshold on the top 24 bits: P(keep) = 1 - p
        thr24 = min(int(round(dropout_rate * (1 << 24))), (1 << 24) - 1)
        keep = (bits >> 8).astype(jnp.int32) >= jnp.int32(thr24)
        feats = jnp.where(keep, feats, jnp.float32(0.0))

    # classifier: Linear(HIDDEN -> NUM_CLASSES); wc already scaled by 1/(1-p)
    logits = jnp.dot(feats.astype(wc_ref.dtype), wc_ref[...],
                     preferred_element_type=jnp.float32) + bc_ref[...]
    out_ref[...] = logits.astype(out_ref.dtype)


# --------------------------- one-time param prep -----------------------------
def prepare_params(wf, bf, wc, bc, dropout_rate):
    """Fold the dropout scale into wc, cast weights to bf16, reshape biases."""
    if dropout_rate > 0.0:
        wc = wc / jnp.float32(1.0 - dropout_rate)
    return (wf.astype(jnp.bfloat16),
            bf.reshape(1, -1).astype(jnp.float32),
            wc.astype(jnp.bfloat16),
            bc.reshape(1, -1).astype(jnp.float32))


# ------------------------------- wrapper -------------------------------------
def dropout_model_forward(x_nchw, wf_bf16, bf2, wc_bf16, bc2, seed,
                          dropout_rate=DROPOUT_RATE):
    """x_nchw: (B, C, H, W) f32 -> logits (B, NUM_CLASSES) f32."""
    b = x_nchw.shape[0]
    d_in = wf_bf16.shape[0]
    hidden = wf_bf16.shape[1]
    n_cls = wc_bf16.shape[1]

    x_flat = x_nchw.reshape(b, -1).astype(jnp.bfloat16)     # (B, D_in) bf16
    seed_arr = jnp.asarray([seed], dtype=jnp.int32)         # scalar prefetch

    tile_b = b if b <= MAX_TILE_B else MAX_TILE_B
    assert b % tile_b == 0, "batch must divide the batch tile"
    num_tiles = b // tile_b

    kernel = functools.partial(_dropout_model_kernel,
                               dropout_rate=dropout_rate,
                               tile_b=tile_b, hidden=hidden)

    grid_spec = pltpu.PrefetchScalarGridSpec(
        num_scalar_prefetch=1,
        grid=(num_tiles,),
        in_specs=[
            pl.BlockSpec((tile_b, d_in), lambda i, s: (i, 0)),     # x tile
            pl.BlockSpec((d_in, hidden), lambda i, s: (0, 0)),     # wf resident
            pl.BlockSpec((1, hidden),    lambda i, s: (0, 0)),     # bf resident
            pl.BlockSpec((hidden, n_cls), lambda i, s: (0, 0)),    # wc resident
            pl.BlockSpec((1, n_cls),     lambda i, s: (0, 0)),     # bc resident
        ],
        out_specs=pl.BlockSpec((tile_b, n_cls), lambda i, s: (i, 0)),
    )

    return pl.pallas_call(
        kernel,
        out_shape=jax.ShapeDtypeStruct((b, n_cls), jnp.float32),
        grid_spec=grid_spec,
        compiler_params=pltpu.CompilerParams(
            dimension_semantics=("parallel",)),
    )(seed_arr, x_flat, wf_bf16, bf2, wc_bf16, bc2)


# ------------------------------- main ----------------------------------------
if __name__ == "__main__":
    key = jax.random.PRNGKey(0)
    kx, kwf, kbf, kwc, kbc = jax.random.split(key, 5)

    # deterministic synthetic parameters (no checkpoint load)
    x = jax.random.normal(kx, (B, C, H, W), dtype=jnp.float32)
    wf = jax.random.normal(kwf, (D_IN, HIDDEN), dtype=jnp.float32) * 0.02
    bf = jax.random.normal(kbf, (HIDDEN,), dtype=jnp.float32) * 0.02
    wc = jax.random.normal(kwc, (HIDDEN, NUM_CLASSES), dtype=jnp.float32) * 0.02
    bc = jax.random.normal(kbc, (NUM_CLASSES,), dtype=jnp.float32) * 0.02

    params = prepare_params(wf, bf, wc, bc, DROPOUT_RATE)
    out = dropout_model_forward(x, *params, seed=1234, dropout_rate=DROPOUT_RATE)
    jax.block_until_ready(out)

    assert out.shape == (B, NUM_CLASSES) and out.dtype == jnp.float32
    assert bool(jnp.all(jnp.isfinite(out)))
    print("KERNEL_OK")
</pallas_src>

<mosaic_0001>
module attributes {stable_mosaic.version = 11 : i64} {
  func.func @_dropout_model_kernel(%arg0: i32, %arg1: memref<1xi32, #tpu.memory_space<smem>>, %arg2: memref<2x1024xbf16, #tpu.memory_space<vmem>>, %arg3: memref<1024x128xbf16, #tpu.memory_space<vmem>>, %arg4: memref<1x128xf32, #tpu.memory_space<vmem>>, %arg5: memref<128x8xbf16, #tpu.memory_space<vmem>>, %arg6: memref<1x8xf32, #tpu.memory_space<vmem>>, %arg7: memref<2x8xf32, #tpu.memory_space<vmem>>) attributes {dimension_semantics = [#tpu.dimension_semantics<parallel>], iteration_bounds = array<i64: 1>, scalar_prefetch = 1 : i64, scratch_operands = 0 : i64, tpu.core_type = #tpu.core_type<tc>, window_params = [{transform_indices = @transform_0, window_bounds = array<i64: 2, 1024>}, {pipeline_mode = #tpu.pipeline_mode<synchronous>, transform_indices = @transform_1, window_bounds = array<i64: 1024, 128>}, {pipeline_mode = #tpu.pipeline_mode<synchronous>, transform_indices = @transform_2, window_bounds = array<i64: 1, 128>}, {pipeline_mode = #tpu.pipeline_mode<synchronous>, transform_indices = @transform_3, window_bounds = array<i64: 128, 8>}, {pipeline_mode = #tpu.pipeline_mode<synchronous>, transform_indices = @transform_4, window_bounds = array<i64: 1, 8>}, {transform_indices = @transform_5, window_bounds = array<i64: 2, 8>}]} {
    %c0 = arith.constant 0 : index
    %c0_0 = arith.constant 0 : index
    %0 = vector.load %arg2[%c0, %c0_0] : memref<2x1024xbf16, #tpu.memory_space<vmem>>, vector<2x1024xbf16>
    %c0_1 = arith.constant 0 : index
    %c0_2 = arith.constant 0 : index
    %1 = vector.load %arg3[%c0_1, %c0_2] : memref<1024x128xbf16, #tpu.memory_space<vmem>>, vector<1024x128xbf16>
    %cst = arith.constant dense<0.000000e+00> : vector<2x128xf32>
    %2 = tpu.matmul %0, %1, %cst {dimension_numbers = #tpu.dot_dimension_numbers<[1], [0], [0], [1], [0, 0, 1, 1], [], []>} : vector<2x1024xbf16>, vector<1024x128xbf16>, vector<2x128xf32> -> vector<2x128xf32>
    %c0_3 = arith.constant 0 : index
    %c0_4 = arith.constant 0 : index
    %3 = vector.load %arg4[%c0_3, %c0_4] : memref<1x128xf32, #tpu.memory_space<vmem>>, vector<1x128xf32>
    %4 = vector.broadcast %3 : vector<1x128xf32> to vector<2x128xf32>
    %5 = arith.addf %2, %4 : vector<2x128xf32>
    %6 = tpu.iota {dimensions = array<i32: 0>} : vector<2x128xi32>
    %c2_i32 = arith.constant 2 : i32
    %7 = arith.muli %arg0, %c2_i32 : i32
    %8 = vector.broadcast %7 : i32 to vector<2x128xi32>
    %9 = arith.addi %6, %8 : vector<2x128xi32>
    %10 = tpu.iota {dimensions = array<i32: 1>} : vector<2x128xi32>
    %c128_i32 = arith.constant 128 : i32
    %11 = vector.broadcast %c128_i32 : i32 to vector<2x128xi32>
    %12 = arith.muli %9, %11 : vector<2x128xi32>
    %13 = arith.addi %12, %10 : vector<2x128xi32>
    %c0_5 = arith.constant 0 : index
    %14 = memref.load %arg1[%c0_5] : memref<1xi32, #tpu.memory_space<smem>>
    %c-1640531527_i32 = arith.constant -1640531527 : i32
    %15 = vector.broadcast %c-1640531527_i32 : i32 to vector<2x128xi32>
    %16 = arith.muli %13, %15 : vector<2x128xi32>
    %17 = vector.broadcast %14 : i32 to vector<2x128xi32>
    %18 = arith.addi %16, %17 : vector<2x128xi32>
    %c16_i32 = arith.constant 16 : i32
    %19 = vector.broadcast %c16_i32 : i32 to vector<2x128xi32>
    %20 = arith.shrui %18, %19 : vector<2x128xi32>
    %21 = arith.xori %18, %20 : vector<2x128xi32>
    %c2146121005_i32 = arith.constant 2146121005 : i32
    %22 = vector.broadcast %c2146121005_i32 : i32 to vector<2x128xi32>
    %23 = arith.muli %21, %22 : vector<2x128xi32>
    %c15_i32 = arith.constant 15 : i32
    %24 = vector.broadcast %c15_i32 : i32 to vector<2x128xi32>
    %25 = arith.shrui %23, %24 : vector<2x128xi32>
    %26 = arith.xori %23, %25 : vector<2x128xi32>
    %c-2073254261_i32 = arith.constant -2073254261 : i32
    %27 = vector.broadcast %c-2073254261_i32 : i32 to vector<2x128xi32>
    %28 = arith.muli %26, %27 : vector<2x128xi32>
    %c16_i32_6 = arith.constant 16 : i32
    %29 = vector.broadcast %c16_i32_6 : i32 to vector<2x128xi32>
    %30 = arith.shrui %28, %29 : vector<2x128xi32>
    %31 = arith.xori %28, %30 : vector<2x128xi32>
    %c8_i32 = arith.constant 8 : i32
    %32 = vector.broadcast %c8_i32 : i32 to vector<2x128xi32>
    %33 = arith.shrui %31, %32 : vector<2x128xi32>
    %c8388608_i32 = arith.constant 8388608 : i32
    %34 = vector.broadcast %c8388608_i32 : i32 to vector<2x128xi32>
    %35 = arith.cmpi sge, %33, %34 : vector<2x128xi32>
    %cst_7 = arith.constant 0.000000e+00 : f32
    %36 = vector.broadcast %cst_7 : f32 to vector<2x128xf32>
    %37 = arith.select %35, %5, %36 : vector<2x128xi1>, vector<2x128xf32>
    %38 = arith.truncf %37 : vector<2x128xf32> to vector<2x128xbf16>
    %c0_8 = arith.constant 0 : index
    %c0_9 = arith.constant 0 : index
    %39 = vector.load %arg5[%c0_8, %c0_9] : memref<128x8xbf16, #tpu.memory_space<vmem>>, vector<128x8xbf16>
    %cst_10 = arith.constant dense<0.000000e+00> : vector<2x8xf32>
    %40 = tpu.matmul %38, %39, %cst_10 {dimension_numbers = #tpu.dot_dimension_numbers<[1], [0], [0], [1], [0, 0, 1, 1], [], []>} : vector<2x128xbf16>, vector<128x8xbf16>, vector<2x8xf32> -> vector<2x8xf32>
    %c0_11 = arith.constant 0 : index
    %c0_12 = arith.constant 0 : index
    %41 = vector.load %arg6[%c0_11, %c0_12] : memref<1x8xf32, #tpu.memory_space<vmem>>, vector<1x8xf32>
    %42 = vector.broadcast %41 : vector<1x8xf32> to vector<2x8xf32>
    %43 = arith.addf %40, %42 : vector<2x8xf32>
    %c0_13 = arith.constant 0 : index
    %c0_14 = arith.constant 0 : index
    %44 = vector.load %arg7[%c0_13, %c0_14] : memref<2x8xf32, #tpu.memory_space<vmem>>, vector<2x8xf32>
    tpu.vector_store %arg7[%c0_13, %c0_14], %43 {strides = array<i32>} : memref<2x8xf32, #tpu.memory_space<vmem>>, vector<2x8xf32>,
    return
  }
  func.func @transform_0(%arg0: i32, %arg1: memref<1xi32, #tpu.memory_space<smem>>) -> (i32, i32) {
    %c0_i32 = arith.constant 0 : i32
    %c0_i32_0 = arith.constant 0 : i32
    return %arg0, %c0_i32 : i32, i32
  }
  func.func @transform_1(%arg0: i32, %arg1: memref<1xi32, #tpu.memory_space<smem>>) -> (i32, i32) {
    %c0_i32 = arith.constant 0 : i32
    %c0_i32_0 = arith.constant 0 : i32
    %c0_i32_1 = arith.constant 0 : i32
    return %c0_i32, %c0_i32_0 : i32, i32
  }
  func.func @transform_2(%arg0: i32, %arg1: memref<1xi32, #tpu.memory_space<smem>>) -> (i32, i32) {
    %c0_i32 = arith.constant 0 : i32
    %c0_i32_0 = arith.constant 0 : i32
    %c0_i32_1 = arith.constant 0 : i32
    return %c0_i32, %c0_i32_0 : i32, i32
  }
  func.func @transform_3(%arg0: i32, %arg1: memref<1xi32, #tpu.memory_space<smem>>) -> (i32, i32) {
    %c0_i32 = arith.constant 0 : i32
    %c0_i32_0 = arith.constant 0 : i32
    %c0_i32_1 = arith.constant 0 : i32
    return %c0_i32, %c0_i32_0 : i32, i32
  }
  func.func @transform_4(%arg0: i32, %arg1: memref<1xi32, #tpu.memory_space<smem>>) -> (i32, i32) {
    %c0_i32 = arith.constant 0 : i32
    %c0_i32_0 = arith.constant 0 : i32
    %c0_i32_1 = arith.constant 0 : i32
    return %c0_i32, %c0_i32_0 : i32, i32
  }
  func.func @transform_5(%arg0: i32, %arg1: memref<1xi32, #tpu.memory_space<smem>>) -> (i32, i32) {
    %c0_i32 = arith.constant 0 : i32
    %c0_i32_0 = arith.constant 0 : i32
    return %arg0, %c0_i32 : i32, i32
  }
}

</mosaic_0001>

<bundles_post_ra>
// kernel: tpu_custom_call.1
= control target key start
LH: loop header
LB: loop body
LE: loop exit
PB: predicated region body
PF: predicated region fallthrough
CT: control target
= control target key end

     0   :  { %12 = vsyncpa [#allocation5], 0  ;;  %s1372_s0 = inlined_call_operand.<no memory space> [shape: s32[1], index: 0, kind: input, shape index: {}]   ;;  %s1373_s1 = inlined_call_operand.vmem [shape: bf16[2,1024], index: 1, kind: input, shape index: {}]   ;;  %s1374_s2 = inlined_call_operand.hbm [shape: bf16[1024,128], index: 2, kind: input, shape index: {}]   ;;  %s1375_s3 = inlined_call_operand.vmem [shape: f32[1,128], index: 3, kind: input, shape index: {}]   ;;  %s1376_s4 = inlined_call_operand.vmem [shape: bf16[128,8], index: 4, kind: input, shape index: {}]   ;;  %s1377_s5 = inlined_call_operand.vmem [shape: f32[1,8], index: 5, kind: input, shape index: {}]   ;;  %s1378_s6 = inlined_call_operand.hbm [shape: f32[2,8], index: 6, kind: output, shape index: {}]  }
   0x1   :  { %13 = vsyncpa [#allocation6], 0  ;;  %s1251_s21 = smov [#allocation4]   ;;  %s1203_s25 = scalar_lea.hbm %s1374_s2, 8192 }
   0x2   :  { %s21_s22 = sshll.u32 %s1251_s21, 4  ;;  %p1204_p0 = scmp.ne.s32.totalorder %s1374_s2, %s1203_s25  ;;  %s22_s22 = int_to_ptr.vmem [resolvable:$true] %s21_s22 }
   0x3   :  { %p1207_p1 = scmp.lt.u32.totalorder %s1203_s25, %s1374_s2 }
   0x5   :  { %p1209_p2 = pnand %p1207_p1, %p1204_p0 }
   0x7   :  { %1212 = shalt.err (!%p1209_p2)
}
   0x8   :  { %s1213_s30 = scalar_lea.vmem %s22_s22, 8192  ;;  %p1218_p4 = scmp.lt.s32.totalorder %s22_s22, %s22_s22 }
   0x9   :  { %p1214_p3 = scmp.ne.s32.totalorder %s22_s22, %s1213_s30  ;;  %p1219_p5 = scmp.lt.s32.totalorder %s1213_s30, %s1213_s30 }
   0xb   :  { %p1220_p6 = por %p1219_p5, %p1218_p4 }
   0xd   :  { %p1221_p7 = pnand %p1220_p6, %p1214_p3 }
   0xf   :  { %1224 = shalt.err (!%p1221_p7)
}
  0x10   :  { %s1252_s7 = smov 64   ;;  %s1253_s8 = smov 4  }
  0x11   :  { %27 = dma.hbm_to_vmem [thread:$0]  %s1374_s2, 8192, %s22_s22, [#allocation5], %s1252_s7, %s1252_s7, %s1253_s8  }
  0x12   :  { %1247 = dma.done.wait [#allocation5], 8192  }
  0x13   :  { %1248 = vsyncadd [#allocation5], 4294959104  ;;  %v1130_v0 = vld [vmem:[#allocation4 + $0x40] sm:$0xff]   ;;  %v1134_v4 = vld [vmem:[#allocation4 + $0x48] sm:$0xff]   ;;  %v1254_v22 = vmov 1966171168   ;;  %v179_v24 = vlaneseq }
  0x14   :  { %v1131_v1 = vld [vmem:[#allocation4 + $0xc0] sm:$0xff]   ;;  %1006 = vmatprep.subr.bf16.mxu0 %v1130_v0  ;;  %v1135_v5 = vld [vmem:[#allocation4 + $0xc8] sm:$0xff]   ;;  %v1138_v8 = vld [vmem:[#allocation4 + $0x50] sm:$0xff]   ;;  %v177_v23 = vunpack.c.l.s4 %v1254_v22  ;;  %vm1256_vm0 = vmmov 0   ;;  %vm912_vm3 = vcmask 58368  }
  0x15   :  { %v1132_v2 = vld [vmem:[#allocation4] sm:$0xff]   ;;  %1028 = vmatprep.subr.bf16.mxu1 %v1131_v1  ;;  %v1136_v6 = vld [vmem:[#allocation4 + $0x8] sm:$0xff]   ;;  %v1139_v9 = vld [vmem:[#allocation4 + $0xd0] sm:$0xff]   ;;  %v1306_v30 = vshrl.u32 %v179_v24, 7 }
  0x16   :  { %v1133_v3 = vld [vmem:[#allocation4 + $0x80] sm:$0xff]   ;;  %1007 = vmatpush3.bf16.msra.mxu0 %v1132_v2  ;;  %v1137_v7 = vld [vmem:[#allocation4 + $0x88] sm:$0xff]   ;;  %v1140_v10 = vld [vmem:[#allocation4 + $0x10] sm:$0xff]   ;;  %v178_v29 = vunpack.c.0.s8 %v177_v23 }
  0x17   :  { %1029 = vmatpush3.bf16.msra.mxu1 %v1133_v3  ;;  %1008 = vmatprep.subr.bf16.mxu0 %v1134_v4  ;;  %v1141_v11 = vld [vmem:[#allocation4 + $0x90] sm:$0xff]   ;;  %v1142_v12 = vld [vmem:[#allocation4 + $0x58] sm:$0xff]   ;;  %v1146_v16 = vld [vmem:[#allocation4 + $0x60] sm:$0xff]  }
  0x18   :  { %1030 = vmatprep.subr.bf16.mxu1 %v1135_v5  ;;  %v1143_v13 = vld [vmem:[#allocation4 + $0xd8] sm:$0xff]   ;;  %v1147_v17 = vld [vmem:[#allocation4 + $0xe0] sm:$0xff]   ;;  %v1150_v20 = vld [vmem:[#allocation4 + $0x68] sm:$0xff]   ;;  %v1309_v35 = vsub.s32 %v178_v29, %v1306_v30 }
  0x19   :  { %v1144_v14 = vld [vmem:[#allocation4 + $0x18] sm:$0xff]   ;;  %v1148_v18 = vld [vmem:[#allocation4 + $0x20] sm:$0xff]   ;;  %v1151_v21 = vld [vmem:[#allocation4 + $0xe8] sm:$0xff]  }
  0x1a   :  { %1009 = vmatpush3.bf16.msra.mxu0 %v1136_v6  ;;  %v1145_v15 = vld [vmem:[#allocation4 + $0x98] sm:$0xff]   ;;  %v1149_v19 = vld [vmem:[#allocation4 + $0xa0] sm:$0xff]   ;;  %v1152_v25 = vld [vmem:[#allocation4 + $0x28] sm:$0xff]  }
  0x1b   :  { %1031 = vmatpush3.bf16.msra.mxu1 %v1137_v7  ;;  %1010 = vmatprep.subr.bf16.mxu0 %v1138_v8  ;;  %v1153_v26 = vld [vmem:[#allocation4 + $0xa8] sm:$0xff]   ;;  %v1154_v27 = vld [vmem:[#allocation4 + $0x70] sm:$0xff]   ;;  %v1158_v33 = vld [vmem:[#allocation4 + $0x78] sm:$0xff]  }
  0x1c   :  { %1032 = vmatprep.subr.bf16.mxu1 %v1139_v9  ;;  %v1155_v28 = vld [vmem:[#allocation4 + $0xf0] sm:$0xff]   ;;  %v1159_v34 = vld [vmem:[#allocation4 + $0xf8] sm:$0xff]   ;;  %v38_v38 = vld [vmem:[%s1373_s1] sm:$0xff] }
  0x1d   :  { %v1156_v31 = vld [vmem:[#allocation4 + $0x30] sm:$0xff]   ;;  %v1160_v36 = vld [vmem:[#allocation4 + $0x38] sm:$0xff]   ;;  %v175_v39 = vcombine.high %v38_v38, %v38_v38  ;;  %v182_v40 = vrot.slane %v38_v38, %v1309_v35  ;;  %v1163_v41 = vld [vmem:[#allocation4 + $0x140] sm:$0xff]  }
  0x1e   :  { %1011 = vmatpush3.bf16.msra.mxu0 %v1140_v10  ;;  %v1157_v32 = vld [vmem:[#allocation4 + $0xb0] sm:$0xff]   ;;  %v1161_v37 = vld [vmem:[#allocation4 + $0xb8] sm:$0xff]   ;;  %v1164_v42 = vld [vmem:[#allocation4 + $0x1c0] sm:$0xff]  }
  0x1f   :  { %1033 = vmatpush3.bf16.msra.mxu1 %v1141_v11  ;;  %1012 = vmatprep.subr.bf16.mxu0 %v1142_v12  ;;  %v190_v43 = vcombine.high %v182_v40, %v182_v40  ;;  %v198_v44 = vrot.slane %v182_v40, %v1309_v35  ;;  %v1317_v45 = vrot.slane %v175_v39, %v1309_v35  ;;  %v1165_v46 = vld [vmem:[#allocation4 + $0x100] sm:$0xff]   ;;  %v1167_v51 = vld [vmem:[#allocation4 + $0x148] sm:$0xff]   ;;  %v1171_v58 = vld [vmem:[#allocation4 + $0x150] sm:$0xff]  }
  0x20   :  { %1034 = vmatprep.subr.bf16.mxu1 %v1143_v13  ;;  %v1166_v48 = vld [vmem:[#allocation4 + $0x180] sm:$0xff]   ;;  %v1168_v53 = vld [vmem:[#allocation4 + $0x1c8] sm:$0xff]   ;;  %v1172_v59 = vld [vmem:[#allocation4 + $0x1d0] sm:$0xff]  }
  0x21   :  { %v212_v47 = vrot.slane %v190_v43, %v1309_v35  ;;  %v191_v49 = vcombine.high %v1317_v45, %v1317_v45  ;;  %v220_v50 = vcombine.high %v198_v44, %v198_v44  ;;  %v1169_v55 = vld [vmem:[#allocation4 + $0x108] sm:$0xff]   ;;  %v1173_v60 = vld [vmem:[#allocation4 + $0x110] sm:$0xff]   ;;  %v1175_v62 = vld [vmem:[#allocation4 + $0x158] sm:$0xff]  }
  0x22   :  { %1013 = vmatpush3.bf16.msra.mxu0 %v1144_v14  ;;  %v1170_v56 = vld [vmem:[#allocation4 + $0x188] sm:$0xff]   ;;  %v1174_v61 = vld [vmem:[#allocation4 + $0x190] sm:$0xff]   ;;  %v1176_v63 = vld [vmem:[#allocation4 + $0x1d8] sm:$0xff]  }
  0x23   :  { %1035 = vmatpush3.bf16.msra.mxu1 %v1145_v15  ;;  %1014 = vmatprep.subr.bf16.mxu0 %v1146_v16  ;;  %v222_v52 = vcombine.high %v212_v47, %v212_v47  ;;  %v219_v54 = vrot.slane %v191_v49, %v1309_v35  ;;  %v1177_v0 = vld [vmem:[#allocation4 + $0x118] sm:$0xff]   ;;  %v1179_v2 = vld [vmem:[#allocation4 + $0x160] sm:$0xff]   ;;  %v1183_v6 = vld [vmem:[#allocation4 + $0x168] sm:$0xff]  }
  0x24   :  { %1036 = vmatprep.subr.bf16.mxu1 %v1147_v17  ;;  %648 = vmatprep.mubr.bf16.mxu0 %v212_v47  ;;  %v1178_v1 = vld [vmem:[#allocation4 + $0x198] sm:$0xff]   ;;  %v1180_v3 = vld [vmem:[#allocation4 + $0x1e0] sm:$0xff]   ;;  %v1184_v7 = vld [vmem:[#allocation4 + $0x1e8] sm:$0xff]  }
  0x25   :  { %688 = vmatprep.mubr.bf16.mxu1 %v222_v52  ;;  %v223_v57 = vcombine.high %v219_v54, %v219_v54  ;;  %v1181_v4 = vld [vmem:[#allocation4 + $0x120] sm:$0xff]   ;;  %v1185_v8 = vld [vmem:[#allocation4 + $0x128] sm:$0xff]   ;;  %v1187_v10 = vld [vmem:[#allocation4 + $0x170] sm:$0xff]  }
  0x26   :  { %1015 = vmatpush3.bf16.msra.mxu0 %v1148_v18  ;;  %v1182_v5 = vld [vmem:[#allocation4 + $0x1a0] sm:$0xff]   ;;  %v1186_v9 = vld [vmem:[#allocation4 + $0x1a8] sm:$0xff]   ;;  %v1188_v11 = vld [vmem:[#allocation4 + $0x1f0] sm:$0xff]   ;;  %v205_v18 = vrot.slane %v1317_v45, %v1309_v35  ;;  %v787_v35 = vstv %s1372_s0 }
  0x27   :  { %1037 = vmatpush3.bf16.msra.mxu1 %v1149_v19  ;;  %1016 = vmatprep.subr.bf16.mxu0 %v1150_v20  ;;  %v1189_v12 = vld [vmem:[#allocation4 + $0x130] sm:$0xff]   ;;  %v1191_v14 = vld [vmem:[#allocation4 + $0x178] sm:$0xff]   ;;  %v1195_v20 = vld [vmem:[%s1376_s4] sm:$0xff]  }
  0x28   :  { %1038 = vmatprep.subr.bf16.mxu1 %v1151_v21  ;;  %v1190_v13 = vld [vmem:[#allocation4 + $0x1b0] sm:$0xff]   ;;  %v1192_v15 = vld [vmem:[#allocation4 + $0x1f8] sm:$0xff]   ;;  %v221_v19 = vcombine.high %v205_v18, %v205_v18  ;;  %v1255_v21 = vmov 0.0   ;;  %v1196_v22 = vld [vmem:[%s1376_s4 + $0x8] sm:$0xff]  }
  0x29   :  { %v1193_v16 = vld [vmem:[#allocation4 + $0x138] sm:$0xff]   ;;  %v1197_v23 = vld [vmem:[%s1376_s4 + $0x10] sm:$0xff]   ;;  %v929_v39 = vld [vmem:[%s1375_s3] ss:$0 sm:$0xff] }
  0x2a   :  { %1017 = vmatpush3.bf16.msra.mxu0 %v1152_v25  ;;  %v1194_v17 = vld [vmem:[#allocation4 + $0x1b8] sm:$0xff]  }
  0x2b   :  { %1039 = vmatpush3.bf16.msra.mxu1 %v1153_v26  ;;  %1018 = vmatprep.subr.bf16.mxu0 %v1154_v27  ;;  %v1198_v25 = vld [vmem:[%s1376_s4 + $0x18] sm:$0xff]   ;;  %v1199_v26 = vld [vmem:[%s1376_s4 + $0x20] sm:$0xff]   ;;  %v1200_v27 = vld [vmem:[%s1376_s4 + $0x28] sm:$0xff]  }
  0x2c   :  { %1040 = vmatprep.subr.bf16.mxu1 %v1155_v28  ;;  %v1201_v28 = vld [vmem:[%s1376_s4 + $0x30] sm:$0xff]   ;;  %v1202_v29 = vld [vmem:[%s1376_s4 + $0x38] sm:$0xff]   ;;  %s1257_s4 = smov [#allocation7]  }
  0x2d   :  { %s920_s7 = sshll.u32 %s1257_s4, 4  ;;  %s921_s7 = int_to_ptr.vmem [resolvable:$true] %s920_s7 }
  0x2e   :  { %1019 = vmatpush3.bf16.msra.mxu0 %v1156_v31  ;;  %v782_v31 = vand.u32 127, %v179_v24  ;;  %s1225_s8 = scalar_lea.vmem %s921_s7, 32  ;;  %p1230_p9 = scmp.lt.s32.totalorder %s921_s7, %s921_s7 }
  0x2f   :  { %1041 = vmatpush3.bf16.msra.mxu1 %v1157_v32  ;;  %1020 = vmatprep.subr.bf16.mxu0 %v1158_v33  ;;  %v783_v32 = vmul.u32 128, %v1306_v30  ;;  %p1226_p8 = scmp.ne.s32.totalorder %s921_s7, %s1225_s8  ;;  %p1231_p10 = scmp.lt.s32.totalorder %s1225_s8, %s1225_s8 }
  0x30   :  { %1042 = vmatprep.subr.bf16.mxu1 %v1159_v34 }
  0x31   :  { %v784_v33 = vadd.s32 %v783_v32, %v782_v31  ;;  %p1232_p11 = por %p1231_p10, %p1230_p9 }
  0x32   :  { %1021 = vmatpush3.bf16.msra.mxu0 %v1160_v36 }
  0x33   :  { %1043 = vmatpush3.bf16.msra.mxu1 %v1161_v37  ;;  %1050 = vmatprep.subr.bf16.mxu0 %v1163_v41  ;;  %v786_v34 = vmul.u32 2654435769, %v784_v33  ;;  %p1233_p12 = pnand %p1232_p11, %p1226_p8 }
  0x34   :  { %1072 = vmatprep.subr.bf16.mxu1 %v1164_v42 }
  0x35   :  { %649 = vmatmul.mubr.bf16.vlgmr.msra.gmra.mrb[0].mxu0 %v198_v44  ;;  %v788_v36 = vadd.s32 %v787_v35, %v786_v34 }
  0x36   :  { %1051 = vmatpush3.bf16.msra.mxu0 %v1165_v46  ;;  %689 = vmatmul.mubr.bf16.vlgmr.msra.gmra.mrb[0].mxu1 %v220_v50 }
  0x37   :  { %1052 = vmatprep.subr.bf16.mxu0 %v1167_v51  ;;  %1073 = vmatpush3.bf16.msra.mxu1 %v1166_v48  ;;  %v789_v38 = vshrl.u32 %v788_v36, 16 }
  0x38   :  { %728 = vmatprep.mubr.bf16.mxu0 %v219_v54  ;;  %1074 = vmatprep.subr.bf16.mxu1 %v1168_v53 }
  0x39   :  { %768 = vmatprep.mubr.bf16.mxu1 %v223_v57  ;;  %v790_v47 = vxor.u32 %v789_v38, %v788_v36 }
  0x3a   :  { %1053 = vmatpush3.bf16.msra.mxu0 %v1169_v55 }
  0x3b   :  { %1054 = vmatprep.subr.bf16.mxu0 %v1171_v58  ;;  %1075 = vmatpush3.bf16.msra.mxu1 %v1170_v56  ;;  %v791_v50 = vmul.u32 2146121005, %v790_v47 }
  0x3c   :  { %1076 = vmatprep.subr.bf16.mxu1 %v1172_v59 }
  0x3d   :  { %v792_v51 = vshrl.u32 %v791_v50, 15 }
  0x3e   :  { %1055 = vmatpush3.bf16.msra.mxu0 %v1173_v60 }
  0x3f   :  { %1056 = vmatprep.subr.bf16.mxu0 %v1175_v62  ;;  %1077 = vmatpush3.bf16.msra.mxu1 %v1174_v61  ;;  %v793_v52 = vxor.u32 %v792_v51, %v791_v50 }
  0x40   :  { %1078 = vmatprep.subr.bf16.mxu1 %v1176_v63 }
  0x41   :  { %v794_v53 = vmul.u32 2221713035, %v793_v52 }
  0x42   :  { %1057 = vmatpush3.bf16.msra.mxu0 %v1177_v0 }
  0x43   :  { %1058 = vmatprep.subr.bf16.mxu0 %v1179_v2  ;;  %1079 = vmatpush3.bf16.msra.mxu1 %v1178_v1  ;;  %v795_v54 = vshrl.u32 %v794_v53, 16 }
  0x44   :  { %1080 = vmatprep.subr.bf16.mxu1 %v1180_v3 }
  0x45   :  { %v796_v55 = vxor.u32 %v795_v54, %v794_v53 }
  0x46   :  { %1059 = vmatpush3.bf16.msra.mxu0 %v1181_v4 }
  0x47   :  { %1060 = vmatprep.subr.bf16.mxu0 %v1183_v6  ;;  %1081 = vmatpush3.bf16.msra.mxu1 %v1182_v5  ;;  %v797_v57 = vshrl.u32 %v796_v55, 8  ;;  %v994_v6 = vld [vmem:[%s1377_s5] ss:$0 sm:$0xff] }
  0x48   :  { %1082 = vmatprep.subr.bf16.mxu1 %v1184_v7 }
  0x49   :  { %vm798_vm1 = vcmp.ge.s32.totalorder %v797_v57, 8388608 }
  0x4a   :  { %1061 = vmatpush3.bf16.msra.mxu0 %v1185_v8  ;;  %vm1003_vm2 = vmpackc.low %vm798_vm1, %vm798_vm1 }
  0x4b   :  { %1062 = vmatprep.subr.bf16.mxu0 %v1187_v10  ;;  %1083 = vmatpush3.bf16.msra.mxu1 %v1186_v9 }
  0x4c   :  { %1084 = vmatprep.subr.bf16.mxu1 %v1188_v11 }
  0x4e   :  { %1063 = vmatpush3.bf16.msra.mxu0 %v1189_v12 }
  0x4f   :  { %1064 = vmatprep.subr.bf16.mxu0 %v1191_v14  ;;  %1085 = vmatpush3.bf16.msra.mxu1 %v1190_v13 }
  0x50   :  { %1086 = vmatprep.subr.bf16.mxu1 %v1192_v15 }
  0x52   :  { %1065 = vmatpush3.bf16.msra.mxu0 %v1193_v16 }
  0x53   :  { %1087 = vmatpush3.bf16.msra.mxu1 %v1194_v17  ;;  %1103 = vmatprep.subr.bf16.mxu0 %v1255_v21 }
  0x55   :  { %729 = vmatmul.mubr.bf16.vlgmr.msra.gmra.mrb[4].mxu0 %v205_v18 }
  0x56   :  { %769 = vmatmul.mubr.bf16.vlgmr.msra.gmra.mrb[4].mxu1 %v221_v19  ;;  %1104 = vmatpush3.bf16.msra.mxu0 %v1195_v20 }
  0x57   :  { %1105 = vmatprep.subr.bf16.mxu0 %v1255_v21  ;;  %1119 = vmatprep.mubr.msk.bf16.mxu0 %vm1256_vm0, %v1255_v21 }
  0x5a   :  { %1106 = vmatpush3.bf16.msra.mxu0 %v1196_v22 }
  0x5b   :  { %1107 = vmatprep.subr.bf16.mxu0 %v1255_v21 }
  0x5e   :  { %1108 = vmatpush3.bf16.msra.mxu0 %v1197_v23 }
  0x5f   :  { %1109 = vmatprep.subr.bf16.mxu0 %v1255_v21 }
  0x62   :  { %1110 = vmatpush3.bf16.msra.mxu0 %v1198_v25 }
  0x63   :  { %1111 = vmatprep.subr.bf16.mxu0 %v1255_v21 }
  0x66   :  { %1112 = vmatpush3.bf16.msra.mxu0 %v1199_v26 }
  0x67   :  { %1113 = vmatprep.subr.bf16.mxu0 %v1255_v21 }
  0x6a   :  { %1114 = vmatpush3.bf16.msra.mxu0 %v1200_v27 }
  0x6b   :  { %1115 = vmatprep.subr.bf16.mxu0 %v1255_v21 }
  0x6e   :  { %1116 = vmatpush3.bf16.msra.mxu0 %v1201_v28 }
  0x6f   :  { %1117 = vmatprep.subr.bf16.mxu0 %v1255_v21 }
  0x72   :  { %1118 = vmatpush3.bf16.msra.mxu0 %v1202_v29 }
 0x108   :  { %v1022_v37 = vpop.f32.mrb[0].mxu0 }
 0x109   :  { %v1023_v40 = vpop.f32.mrb[1].mxu0  ;;  %v1044_v41 = vpop.f32.mrb[0].mxu1 }
 0x10a   :  { %v1024_v42 = vadd.f32 %v1023_v40, %v1022_v37  ;;  %v1025_v43 = vpop.f32.mrb[2].mxu0  ;;  %v1045_v24 = vpop.f32.mrb[1].mxu1 }
 0x10b   :  { %v1026_v44 = vpop.f32.mrb[3].mxu0  ;;  %v1046_v45 = vadd.f32 %v1045_v24, %v1044_v41  ;;  %v1047_v46 = vpop.f32.mrb[2].mxu1 }
 0x10c   :  { %v651_v30 = vadd.f32 %v1024_v42, %v929_v39  ;;  %v1048_v48 = vpop.f32.mrb[3].mxu1 }
 0x10e   :  { %v691_v49 = vadd.f32 %v1046_v45, %v651_v30 }
 0x128   :  { %v1066_v56 = vpop.f32.mrb[4].mxu0 }
 0x129   :  { %v1067_v58 = vpop.f32.mrb[5].mxu0  ;;  %v1088_v59 = vpop.f32.mrb[4].mxu1 }
 0x12a   :  { %v1068_v60 = vadd.f32 %v1067_v58, %v1066_v56  ;;  %v1069_v61 = vpop.f32.mrb[6].mxu0  ;;  %v1089_v62 = vpop.f32.mrb[5].mxu1 }
 0x12b   :  { %v1070_v63 = vpop.f32.mrb[7].mxu0  ;;  %v1090_v1 = vadd.f32 %v1089_v62, %v1088_v59  ;;  %v1091_v2 = vpop.f32.mrb[6].mxu1 }
 0x12c   :  { %v731_v0 = vadd.f32 %v1068_v60, %v691_v49  ;;  %v1092_v3 = vpop.f32.mrb[7].mxu1 }
 0x12e   :  { %v771_v4 = vadd.f32 %v1090_v1, %v731_v0 }
 0x130   :  { %v1004_v5 = vpack.c.bf16 %v771_v4, %v771_v4 }
 0x132   :  { %1120 = vmatmul.mubr.msk.bf16.vlgmr.msra.gmra.mrb[8].mxu0 %vm1003_vm2, %v1004_v5 }
 0x205   :  { %v906_v7 = vpop.f32.mrb[8].mxu0 }
 0x206   :  { %v907_v8 = vadd.f32 %v994_v6, %v906_v7  ;;  %v1121_v9 = vpop.f32.mrb[9].mxu0 }
 0x207   :  { %v909_v10 = vpop.f32.mrb[10].mxu0 }
 0x208   :  { %v1122_v11 = vpop.f32.mrb[11].mxu0  ;;  %913 = vst.msk [vmem:[#allocation7] sm:$0x3] %vm912_vm3, %v907_v8 }
 0x209   :  { %1236 = shalt.err (!%p1233_p12)
}
 0x20a   :  { %s1237_s5 = scalar_lea.hbm %s1378_s6, 32 }
 0x20b   :  { %p1238_p13 = scmp.ne.s32.totalorder %s1378_s6, %s1237_s5  ;;  %p1241_p0 = scmp.lt.u32.totalorder %s1237_s5, %s1378_s6 }
 0x20d   :  { %p1243_p1 = pnand %p1241_p0, %p1238_p13 }
 0x20f   :  { %1246 = shalt.err (!%p1243_p1)
}
 0x210   :  { %923 = dma.vmem_to_hbm [thread:$0]  %s921_s7, 32, %s1378_s6, [#allocation6]  }
 0x211   :  { %1249 = dma.done.wait [#allocation6], 32  }
 0x212   :  { %1250 = vsyncadd [#allocation6], 4294967264 }
 0x213   :  { %927 = vsyncpa [#allocation5], 1 }
 0x214   :  { %928 = vsyncpa [#allocation6], 1 }

</bundles_post_ra>
